<compile_context>
chip_gen: v5e
topology: v5e:2x2
jax: 0.10.0
libtpu: 0.0.40
codegen_flags: <defaults>
</compile_context>

<pallas_src>
import jax
import jax.numpy as jnp
from jax.experimental import pallas as pl
from jax.experimental.pallas import tpu as pltpu


def _copy_kernel(x_ref, o_ref):
    # Pure tile copy: EmptyModule.forward is the identity.
    o_ref[...] = x_ref[...]


def _identity_copy_2d(x2d, tm):
    rows, lanes = x2d.shape
    return pl.pallas_call(
        _copy_kernel,
        out_shape=jax.ShapeDtypeStruct(x2d.shape, x2d.dtype),
        grid_spec=pl.GridSpec(
            grid=(pl.cdiv(rows, tm),),
            in_specs=[pl.BlockSpec((tm, lanes), lambda i: (i, 0))],
            out_specs=pl.BlockSpec((tm, lanes), lambda i: (i, 0)),
        ),
        # Identity: let the output reuse the input HBM buffer so XLA does not
        # have to allocate / write a second full-size array.
        input_output_aliases={0: 0},
        compiler_params=pltpu.CompilerParams(
            # Row-tile axis is embarrassingly parallel: lets v7x's two
            # TensorCores split the bandwidth work; no-op on v5e/v6e.
            dimension_semantics=("parallel",),
        ),
    )(x2d)


def _empty_module_forward_impl(x):
    """Pallas implementation of EmptyModule.forward: returns x unchanged."""
    orig_shape = x.shape
    total = 1
    for d in orig_shape:
        total *= d

    # Identity needs no compute: for shapes we cannot lay out lane-dense
    # (empty, or element count not a multiple of 128), just pass x through.
    if total == 0 or total % 128 != 0:
        return x

    # Lane-dense flatten: pick the widest lane count (multiple of 128) that
    # divides the element count so stores are full, unmasked vst's.
    lanes = 128
    for cand in (1024, 512, 256, 128):
        if total % cand == 0:
            lanes = cand
            break
    rows = total // lanes

    # Tile the leading (sublane) dim. Keep each tile ~2 MiB so the
    # double-buffered in/out buffers stay well inside v7x's smaller VMEM,
    # and keep TM a multiple of the dtype's sublane packing.
    dtype_bytes = jnp.dtype(x.dtype).itemsize
    sublane = max(8, 32 // dtype_bytes)  # 8 for f32, 16 for bf16, 32 for int8
    tm_cap = max(sublane, (2 * 1024 * 1024) // (lanes * dtype_bytes))
    tm_cap = (tm_cap // sublane) * sublane
    tm = rows if rows <= tm_cap else tm_cap

    x2d = x.reshape(rows, lanes)          # layout glue only, no compute
    out2d = _identity_copy_2d(x2d, tm)
    return out2d.reshape(orig_shape)


# Shapes are static under jit, so the Python-level tiling logic is resolved
# at trace time; jit also lets XLA honor the input/output aliasing cleanly.
empty_module_forward = jax.jit(_empty_module_forward_impl)


if __name__ == "__main__":
    key = jax.random.PRNGKey(0)
    # Small NCHW input: batch=2, channels=4, spatial=16x16
    x = jax.random.normal(key, (2, 4, 16, 16), dtype=jnp.float32)

    y = empty_module_forward(x)
    jax.block_until_ready(y)

    assert y.shape == x.shape and y.dtype == x.dtype
    assert bool(jnp.all(y == x))
    print("KERNEL_OK")
</pallas_src>

<mosaic_0001>
module attributes {stable_mosaic.version = 11 : i64} {
  func.func @_copy_kernel(%arg0: i32, %arg1: memref<2x1024xf32, #tpu.memory_space<vmem>>, %arg2: memref<2x1024xf32, #tpu.memory_space<vmem>>) attributes {dimension_semantics = [#tpu.dimension_semantics<parallel>], iteration_bounds = array<i64: 1>, scalar_prefetch = 0 : i64, scratch_operands = 0 : i64, tpu.core_type = #tpu.core_type<tc>, window_params = [{transform_indices = @transform_0, window_bounds = array<i64: 2, 1024>}, {transform_indices = @transform_1, window_bounds = array<i64: 2, 1024>}]} {
    %c0 = arith.constant 0 : index
    %c0_0 = arith.constant 0 : index
    %0 = vector.load %arg1[%c0, %c0_0] : memref<2x1024xf32, #tpu.memory_space<vmem>>, vector<2x1024xf32>
    %c0_1 = arith.constant 0 : index
    %c0_2 = arith.constant 0 : index
    %1 = vector.load %arg2[%c0_1, %c0_2] : memref<2x1024xf32, #tpu.memory_space<vmem>>, vector<2x1024xf32>
    tpu.vector_store %arg2[%c0_1, %c0_2], %0 {strides = array<i32>} : memref<2x1024xf32, #tpu.memory_space<vmem>>, vector<2x1024xf32>,
    return
  }
  func.func @transform_0(%arg0: i32) -> (i32, i32) {
    %c0_i32 = arith.constant 0 : i32
    %c0_i32_0 = arith.constant 0 : i32
    return %arg0, %c0_i32 : i32, i32
  }
  func.func @transform_1(%arg0: i32) -> (i32, i32) {
    %c0_i32 = arith.constant 0 : i32
    %c0_i32_0 = arith.constant 0 : i32
    return %arg0, %c0_i32 : i32, i32
  }
}

</mosaic_0001>

<bundles_post_ra>
// kernel: _empty_module_forward_impl.1
= control target key start
LH: loop header
LB: loop body
LE: loop exit
PB: predicated region body
PF: predicated region fallthrough
CT: control target
= control target key end

     0   :  { %s38_s0 = inlined_call_operand.vmem [shape: f32[2,1024], index: 0, kind: input, shape index: {}, may-alias: {0,1}]   ;;  %s39_s1 = inlined_call_operand.vmem [shape: f32[2,1024], index: 1, kind: output, shape index: {}, may-alias: {0,1}]  }
   0x1   :  { %v8_v0 = vld [vmem:[%s38_s0] sm:$0xff]  ;;  %v9_v1 = vld [vmem:[%s38_s0 + $0x8] sm:$0xff] }
   0x2   :  { %10 = vst [vmem:[%s39_s1] sm:$0xff] %v8_v0 }
   0x3   :  { %11 = vst [vmem:[%s39_s1 + $0x8] sm:$0xff] %v9_v1 }

</bundles_post_ra>
